<compile_context>
chip_gen: v7x
topology: tpu7x:2x2x1
jax: 0.10.0
libtpu: 0.0.40
codegen_flags: <defaults>
</compile_context>

<pallas_src>
import functools

import jax
import jax.numpy as jnp
from jax import lax
from jax.experimental import pallas as pl
from jax.experimental.pallas import tpu as pltpu


def _coral_partial_kernel(fs_ref, ft_ref, sum_s_ref, sum_t_ref, gdiff_ref, *,
                          n_true: int, tiles_per_split: int, need_mask: bool,
                          precision):
    """Accumulates per-split row sums and the Gram difference fs^Tfs - ft^Tft."""
    c = pl.program_id(0)           # core-split index ("parallel")
    i = pl.program_id(1)           # row tile within this split ("arbitrary")
    tm = fs_ref.shape[0]

    @pl.when(i == 0)
    def _init():
        sum_s_ref[...] = jnp.zeros_like(sum_s_ref)
        sum_t_ref[...] = jnp.zeros_like(sum_t_ref)
        gdiff_ref[...] = jnp.zeros_like(gdiff_ref)

    dn = (((0,), (0,)), ((), ()))   # contract axis 0 of both -> no transpose

    def _accumulate(fs, ft):
        # Fold the f32 cast into the reduction (no full f32 tile copy).
        sum_s_ref[...] += jnp.sum(fs, axis=0, keepdims=True, dtype=jnp.float32)
        sum_t_ref[...] += jnp.sum(ft, axis=0, keepdims=True, dtype=jnp.float32)
        gs = lax.dot_general(fs, fs, dn, precision=precision,
                             preferred_element_type=jnp.float32)
        gt = lax.dot_general(ft, ft, dn, precision=precision,
                             preferred_element_type=jnp.float32)
        gdiff_ref[...] += gs - gt   # single accumulator read-modify-write

    if need_mask:
        # Nominal (unclamped) first row of this tile; the index_map clamps the
        # DMA, the mask below zeroes any row that is out of bounds (covers both
        # the partial tail tile and fully-phantom tiles of the last split).
        row0 = (c * tiles_per_split + i) * tm
        is_full = row0 + tm <= n_true

        @pl.when(is_full)
        def _full_tile():
            _accumulate(fs_ref[...], ft_ref[...])

        @pl.when(jnp.logical_not(is_full))
        def _tail_tile():
            rows = row0 + lax.broadcasted_iota(jnp.int32, (tm, 1), 0)
            valid = rows < n_true
            fs = fs_ref[...]
            ft = ft_ref[...]
            fs = jnp.where(valid, fs, jnp.zeros_like(fs))
            ft = jnp.where(valid, ft, jnp.zeros_like(ft))
            _accumulate(fs, ft)
    else:
        _accumulate(fs_ref[...], ft_ref[...])


def coral_loss(f_s: jax.Array, f_t: jax.Array, *,
               row_tile: int | None = None,
               num_splits: int | None = None,
               matmul_precision=None) -> jax.Array:
    """Pallas implementation of CorrelationAlignmentLoss.forward."""
    assert f_s.shape == f_t.shape and f_s.ndim == 2
    N, d = f_s.shape
    assert N >= 2, "CORAL needs at least 2 samples (PyTorch divides by N-1)."

    itemsize = jnp.dtype(f_s.dtype).itemsize
    if matmul_precision is None:
        # Faithful f32 Gram for f32 inputs; bf16 inputs are single-pass anyway.
        matmul_precision = (lax.Precision.HIGHEST
                            if f_s.dtype == jnp.float32 else None)

    # Lane pad only when the feature dim is not 128-aligned.
    if d % 128 != 0:
        d_lane = ((d + 127) // 128) * 128
        f_s = jnp.pad(f_s, ((0, 0), (0, d_lane - d)))
        f_t = jnp.pad(f_t, ((0, 0), (0, d_lane - d)))
    else:
        d_lane = d

    # Generation-aware VMEM budget.
    try:
        vmem_cap = int(pltpu.get_tpu_info().vmem_capacity_bytes)
    except Exception:
        vmem_cap = 64 * 1024 * 1024
    big_vmem = vmem_cap > 96 * 1024 * 1024           # v5e/v6e (128 MiB parts)
    headroom = (16 if big_vmem else 8) * 1024 * 1024
    vmem_limit = int(max(16 * 1024 * 1024, min(vmem_cap - headroom,
                                               128 * 1024 * 1024)))

    # Row tile: 128-aligned, sized from a per-input-tile budget (8 MiB on
    # 128-MiB parts, 4 MiB on v7x), 16-aligned for packed (bf16) inputs.
    sub = 8 if itemsize >= 4 else 16
    n_sub = ((N + sub - 1) // sub) * sub
    if row_tile is None:
        budget = (8 if big_vmem else 4) * 1024 * 1024
        tm = budget // max(1, d_lane * itemsize)
        tm = max(128, (tm // 128) * 128)
    else:
        tm = max(sub, row_tile)
    tm = min(tm, n_sub)
    tm = max(sub, (tm // sub) * sub)

    # Keep the resident set (d^2 accumulator + double-buffered inputs) in VMEM.
    def _est_vmem(tm_):
        return (2 * d_lane * d_lane * 4            # Gram-diff output block (x2)
                + 2 * 2 * tm_ * d_lane * itemsize  # 2 inputs x 2 pipeline bufs
                + 4 * 2 * d_lane * 4               # row-sum blocks
                + (1 << 20))                       # slack
    while tm > sub and _est_vmem(tm) > vmem_limit:
        tm = max(sub, ((tm // 2) // sub) * sub)

    tiles_total = pl.cdiv(N, tm)

    # Split the N reduction across TensorCores via a leading "parallel" axis.
    # On 1-TC chips (v5e/v6e) this runs serially at negligible cost.
    # TODO(synk): query the actual TensorCore count instead of assuming 2.
    if num_splits is None:
        num_splits = 2
    num_splits = max(1, min(num_splits, tiles_total))
    tiles_per_split = pl.cdiv(tiles_total, num_splits)

    # Mask only if the nominal tile coverage exceeds the true batch size.
    need_mask = (num_splits * tiles_per_split * tm) != N

    def row_map(c, i):
        return (jnp.minimum(c * tiles_per_split + i, tiles_total - 1), 0)

    kernel = functools.partial(
        _coral_partial_kernel,
        n_true=N, tiles_per_split=tiles_per_split, need_mask=need_mask,
        precision=matmul_precision)

    cost = pl.CostEstimate(
        flops=int(4 * N * d_lane * d_lane + 4 * N * d_lane),
        transcendentals=0,
        bytes_accessed=int(2 * N * d_lane * itemsize
                           + num_splits * (d_lane * d_lane + 2 * d_lane) * 4),
    )

    sum_s, sum_t, gdiff = pl.pallas_call(
        kernel,
        out_shape=(
            jax.ShapeDtypeStruct((num_splits, 1, d_lane), jnp.float32),
            jax.ShapeDtypeStruct((num_splits, 1, d_lane), jnp.float32),
            jax.ShapeDtypeStruct((num_splits, d_lane, d_lane), jnp.float32),
        ),
        grid=(num_splits, tiles_per_split),
        in_specs=[
            pl.BlockSpec((tm, d_lane), row_map),
            pl.BlockSpec((tm, d_lane), row_map),
        ],
        out_specs=(
            pl.BlockSpec((None, 1, d_lane), lambda c, i: (c, 0, 0)),
            pl.BlockSpec((None, 1, d_lane), lambda c, i: (c, 0, 0)),
            pl.BlockSpec((None, d_lane, d_lane), lambda c, i: (c, 0, 0)),
        ),
        compiler_params=pltpu.CompilerParams(
            dimension_semantics=("parallel", "arbitrary"),
            vmem_limit_bytes=vmem_limit,
        ),
        cost_estimate=cost,
    )(f_s, f_t)

    # Tiny O(d^2) finalize in plain JAX (combine splits, mean-correct, norms).
    n = jnp.float32(N)
    sum_s = jnp.sum(sum_s, axis=0)[:, :d]        # (1, d)
    sum_t = jnp.sum(sum_t, axis=0)[:, :d]
    g = jnp.sum(gdiff, axis=0)[:d, :d]           # fs^T fs - ft^T ft  (true d x d)

    mean_s = sum_s / n
    mean_t = sum_t / n
    md = mean_s - mean_t
    mean_diff = jnp.mean(md * md)

    # Exact f32 outer products via broadcasting (no MXU, no rounding surprises).
    outer = mean_s.T * mean_s - mean_t.T * mean_t      # (d, d)
    cov_d = (g - n * outer) / jnp.float32(N - 1)
    cov_diff = jnp.mean(cov_d * cov_d)
    return mean_diff + cov_diff


def _coral_ref(f_s, f_t):
    # Pure-JAX reference matching the PyTorch forward exactly (f32 precision).
    f_s = f_s.astype(jnp.float32)
    f_t = f_t.astype(jnp.float32)
    n = f_s.shape[0]
    hp = lax.Precision.HIGHEST
    mean_s = jnp.mean(f_s, axis=0, keepdims=True)
    mean_t = jnp.mean(f_t, axis=0, keepdims=True)
    cent_s = f_s - mean_s
    cent_t = f_t - mean_t
    cov_s = jnp.matmul(cent_s.T, cent_s, precision=hp) / (n - 1)
    cov_t = jnp.matmul(cent_t.T, cent_t, precision=hp) / (n - 1)
    mean_diff = jnp.mean((mean_s - mean_t) ** 2)
    cov_diff = jnp.mean((cov_s - cov_t) ** 2)
    return mean_diff + cov_diff


if __name__ == "__main__":
    key = jax.random.PRNGKey(0)
    k_s, k_t = jax.random.split(key)

    # Small shape consistent with the module: (N, d) feature batches.
    N, d = 8, 32
    f_s = jax.random.normal(k_s, (N, d), dtype=jnp.float32)
    f_t = jax.random.normal(k_t, (N, d), dtype=jnp.float32) * 1.5 + 0.3

    loss = coral_loss(f_s, f_t)
    jax.block_until_ready(loss)
    ref = _coral_ref(f_s, f_t)
    assert jnp.allclose(loss, ref, rtol=2e-4, atol=1e-6), (loss, ref)

    # Non-aligned shape with a small forced tile: exercises the parallel core
    # split, the lane pad, the partial tail tile and fully-masked phantom tile.
    N2, d2 = 37, 200
    f_s2 = jax.random.normal(jax.random.PRNGKey(1), (N2, d2), dtype=jnp.float32)
    f_t2 = jax.random.normal(jax.random.PRNGKey(2), (N2, d2), dtype=jnp.float32) * 0.8 - 0.2
    loss2 = coral_loss(f_s2, f_t2, row_tile=16)
    jax.block_until_ready(loss2)
    ref2 = _coral_ref(f_s2, f_t2)
    assert jnp.allclose(loss2, ref2, rtol=2e-4, atol=1e-6), (loss2, ref2)

    # Aligned multi-tile, multi-split case with no masking.
    N3, d3 = 256, 256
    f_s3 = jax.random.normal(jax.random.PRNGKey(3), (N3, d3), dtype=jnp.float32)
    f_t3 = jax.random.normal(jax.random.PRNGKey(4), (N3, d3), dtype=jnp.float32) * 1.2 + 0.1
    loss3 = coral_loss(f_s3, f_t3, row_tile=128)
    jax.block_until_ready(loss3)
    ref3 = _coral_ref(f_s3, f_t3)
    assert jnp.allclose(loss3, ref3, rtol=2e-4, atol=1e-6), (loss3, ref3)

    print("KERNEL_OK")
</pallas_src>

<mosaic_0001>
module attributes {stable_mosaic.version = 11 : i64} {
  func.func @_coral_partial_kernel(%arg0: i32, %arg1: i32, %arg2: memref<8x128xf32, #tpu.memory_space<vmem>>, %arg3: memref<8x128xf32, #tpu.memory_space<vmem>>, %arg4: memref<1x1x128xf32, #tpu.memory_space<vmem>>, %arg5: memref<1x1x128xf32, #tpu.memory_space<vmem>>, %arg6: memref<1x128x128xf32, #tpu.memory_space<vmem>>) attributes {dimension_semantics = [#tpu.dimension_semantics<parallel>, #tpu.dimension_semantics<arbitrary>], iteration_bounds = array<i64: 1, 1>, scalar_prefetch = 0 : i64, scratch_operands = 0 : i64, tpu.core_type = #tpu.core_type<tc>, window_params = [{transform_indices = @transform_0, window_bounds = array<i64: 8, 128>}, {transform_indices = @transform_1, window_bounds = array<i64: 8, 128>}, {transform_indices = @transform_2, window_bounds = array<i64: 1, 1, 128>}, {transform_indices = @transform_3, window_bounds = array<i64: 1, 1, 128>}, {transform_indices = @transform_4, window_bounds = array<i64: 1, 128, 128>}]} {
    %c0_i32 = arith.constant 0 : i32
    %0 = arith.cmpi eq, %arg1, %c0_i32 : i32
    %1 = arith.extui %0 : i1 to i32
    %c0_i32_0 = arith.constant 0 : i32
    %2 = arith.cmpi ne, %1, %c0_i32_0 : i32
    scf.if %2 {
      %cst_25 = arith.constant 0.000000e+00 : f32
      %30 = vector.broadcast %cst_25 : f32 to vector<1x128xf32>
      %c0_26 = arith.constant 0 : index
      %c0_27 = arith.constant 0 : index
      %c0_28 = arith.constant 0 : index
      %31 = vector.load %arg4[%c0_26, %c0_27, %c0_28] : memref<1x1x128xf32, #tpu.memory_space<vmem>>, vector<1x1x128xf32>
      %32 = vector.shape_cast %31 : vector<1x1x128xf32> to vector<1x128xf32>
      %33 = vector.shape_cast %30 : vector<1x128xf32> to vector<1x1x128xf32>
      tpu.vector_store %arg4[%c0_26, %c0_27, %c0_28], %33 {strides = array<i32>} : memref<1x1x128xf32, #tpu.memory_space<vmem>>, vector<1x1x128xf32>,
      %cst_29 = arith.constant 0.000000e+00 : f32
      %34 = vector.broadcast %cst_29 : f32 to vector<1x128xf32>
      %c0_30 = arith.constant 0 : index
      %c0_31 = arith.constant 0 : index
      %c0_32 = arith.constant 0 : index
      %35 = vector.load %arg5[%c0_30, %c0_31, %c0_32] : memref<1x1x128xf32, #tpu.memory_space<vmem>>, vector<1x1x128xf32>
      %36 = vector.shape_cast %35 : vector<1x1x128xf32> to vector<1x128xf32>
      %37 = vector.shape_cast %34 : vector<1x128xf32> to vector<1x1x128xf32>
      tpu.vector_store %arg5[%c0_30, %c0_31, %c0_32], %37 {strides = array<i32>} : memref<1x1x128xf32, #tpu.memory_space<vmem>>, vector<1x1x128xf32>,
      %cst_33 = arith.constant 0.000000e+00 : f32
      %38 = vector.broadcast %cst_33 : f32 to vector<128x128xf32>
      %c0_34 = arith.constant 0 : index
      %c0_35 = arith.constant 0 : index
      %c0_36 = arith.constant 0 : index
      %39 = vector.load %arg6[%c0_34, %c0_35, %c0_36] : memref<1x128x128xf32, #tpu.memory_space<vmem>>, vector<1x128x128xf32>
      %40 = vector.shape_cast %39 : vector<1x128x128xf32> to vector<128x128xf32>
      %41 = vector.shape_cast %38 : vector<128x128xf32> to vector<1x128x128xf32>
      tpu.vector_store %arg6[%c0_34, %c0_35, %c0_36], %41 {strides = array<i32>} : memref<1x128x128xf32, #tpu.memory_space<vmem>>, vector<1x128x128xf32>,
    } else {
    }
    %c0 = arith.constant 0 : index
    %c0_1 = arith.constant 0 : index
    %3 = vector.load %arg2[%c0, %c0_1] : memref<8x128xf32, #tpu.memory_space<vmem>>, vector<8x128xf32>
    %c0_2 = arith.constant 0 : index
    %c0_3 = arith.constant 0 : index
    %4 = vector.load %arg3[%c0_2, %c0_3] : memref<8x128xf32, #tpu.memory_space<vmem>>, vector<8x128xf32>
    %c0_4 = arith.constant 0 : index
    %c0_5 = arith.constant 0 : index
    %c0_6 = arith.constant 0 : index
    %5 = vector.load %arg4[%c0_4, %c0_5, %c0_6] : memref<1x1x128xf32, #tpu.memory_space<vmem>>, vector<1x1x128xf32>
    %6 = vector.shape_cast %5 : vector<1x1x128xf32> to vector<1x128xf32>
    %cst = arith.constant dense<0.000000e+00> : vector<128xf32>
    %7 = vector.multi_reduction <add>, %3, %cst [0] : vector<8x128xf32> to vector<128xf32>
    %8 = vector.shape_cast %7 : vector<128xf32> to vector<1x128xf32>
    %9 = arith.addf %6, %8 : vector<1x128xf32>
    %c0_7 = arith.constant 0 : index
    %c0_8 = arith.constant 0 : index
    %c0_9 = arith.constant 0 : index
    %10 = vector.load %arg4[%c0_7, %c0_8, %c0_9] : memref<1x1x128xf32, #tpu.memory_space<vmem>>, vector<1x1x128xf32>
    %11 = vector.shape_cast %10 : vector<1x1x128xf32> to vector<1x128xf32>
    %12 = vector.shape_cast %9 : vector<1x128xf32> to vector<1x1x128xf32>
    tpu.vector_store %arg4[%c0_7, %c0_8, %c0_9], %12 {strides = array<i32>} : memref<1x1x128xf32, #tpu.memory_space<vmem>>, vector<1x1x128xf32>,
    %c0_10 = arith.constant 0 : index
    %c0_11 = arith.constant 0 : index
    %c0_12 = arith.constant 0 : index
    %13 = vector.load %arg5[%c0_10, %c0_11, %c0_12] : memref<1x1x128xf32, #tpu.memory_space<vmem>>, vector<1x1x128xf32>
    %14 = vector.shape_cast %13 : vector<1x1x128xf32> to vector<1x128xf32>
    %cst_13 = arith.constant dense<0.000000e+00> : vector<128xf32>
    %15 = vector.multi_reduction <add>, %4, %cst_13 [0] : vector<8x128xf32> to vector<128xf32>
    %16 = vector.shape_cast %15 : vector<128xf32> to vector<1x128xf32>
    %17 = arith.addf %14, %16 : vector<1x128xf32>
    %c0_14 = arith.constant 0 : index
    %c0_15 = arith.constant 0 : index
    %c0_16 = arith.constant 0 : index
    %18 = vector.load %arg5[%c0_14, %c0_15, %c0_16] : memref<1x1x128xf32, #tpu.memory_space<vmem>>, vector<1x1x128xf32>
    %19 = vector.shape_cast %18 : vector<1x1x128xf32> to vector<1x128xf32>
    %20 = vector.shape_cast %17 : vector<1x128xf32> to vector<1x1x128xf32>
    tpu.vector_store %arg5[%c0_14, %c0_15, %c0_16], %20 {strides = array<i32>} : memref<1x1x128xf32, #tpu.memory_space<vmem>>, vector<1x1x128xf32>,
    %cst_17 = arith.constant dense<0.000000e+00> : vector<128x128xf32>
    %21 = tpu.matmul %3, %3, %cst_17 {dimension_numbers = #tpu.dot_dimension_numbers<[0], [0], [1], [1], [0, 1, 1, 1], [], []>, precision = #tpu.contract_precision<fp32>} : vector<8x128xf32>, vector<8x128xf32>, vector<128x128xf32> -> vector<128x128xf32>
    %cst_18 = arith.constant dense<0.000000e+00> : vector<128x128xf32>
    %22 = tpu.matmul %4, %4, %cst_18 {dimension_numbers = #tpu.dot_dimension_numbers<[0], [0], [1], [1], [0, 1, 1, 1], [], []>, precision = #tpu.contract_precision<fp32>} : vector<8x128xf32>, vector<8x128xf32>, vector<128x128xf32> -> vector<128x128xf32>
    %c0_19 = arith.constant 0 : index
    %c0_20 = arith.constant 0 : index
    %c0_21 = arith.constant 0 : index
    %23 = vector.load %arg6[%c0_19, %c0_20, %c0_21] : memref<1x128x128xf32, #tpu.memory_space<vmem>>, vector<1x128x128xf32>
    %24 = vector.shape_cast %23 : vector<1x128x128xf32> to vector<128x128xf32>
    %25 = arith.subf %21, %22 : vector<128x128xf32>
    %26 = arith.addf %24, %25 : vector<128x128xf32>
    %c0_22 = arith.constant 0 : index
    %c0_23 = arith.constant 0 : index
    %c0_24 = arith.constant 0 : index
    %27 = vector.load %arg6[%c0_22, %c0_23, %c0_24] : memref<1x128x128xf32, #tpu.memory_space<vmem>>, vector<1x128x128xf32>
    %28 = vector.shape_cast %27 : vector<1x128x128xf32> to vector<128x128xf32>
    %29 = vector.shape_cast %26 : vector<128x128xf32> to vector<1x128x128xf32>
    tpu.vector_store %arg6[%c0_22, %c0_23, %c0_24], %29 {strides = array<i32>} : memref<1x128x128xf32, #tpu.memory_space<vmem>>, vector<1x128x128xf32>,
    return
  }
  func.func @transform_0(%arg0: i32, %arg1: i32) -> (i32, i32) {
    %c1_i32 = arith.constant 1 : i32
    %0 = arith.muli %arg0, %c1_i32 : i32
    %1 = arith.addi %0, %arg1 : i32
    %c0_i32 = arith.constant 0 : i32
    %2 = arith.minsi %1, %c0_i32 : i32
    %c0_i32_0 = arith.constant 0 : i32
    %c0_i32_1 = arith.constant 0 : i32
    return %2, %c0_i32_0 : i32, i32
  }
  func.func @transform_1(%arg0: i32, %arg1: i32) -> (i32, i32) {
    %c1_i32 = arith.constant 1 : i32
    %0 = arith.muli %arg0, %c1_i32 : i32
    %1 = arith.addi %0, %arg1 : i32
    %c0_i32 = arith.constant 0 : i32
    %2 = arith.minsi %1, %c0_i32 : i32
    %c0_i32_0 = arith.constant 0 : i32
    %c0_i32_1 = arith.constant 0 : i32
    return %2, %c0_i32_0 : i32, i32
  }
  func.func @transform_2(%arg0: i32, %arg1: i32) -> (i32, i32, i32) {
    %c0_i32 = arith.constant 0 : i32
    %c0_i32_0 = arith.constant 0 : i32
    %c0_i32_1 = arith.constant 0 : i32
    return %arg0, %c0_i32, %c0_i32_0 : i32, i32, i32
  }
  func.func @transform_3(%arg0: i32, %arg1: i32) -> (i32, i32, i32) {
    %c0_i32 = arith.constant 0 : i32
    %c0_i32_0 = arith.constant 0 : i32
    %c0_i32_1 = arith.constant 0 : i32
    return %arg0, %c0_i32, %c0_i32_0 : i32, i32, i32
  }
  func.func @transform_4(%arg0: i32, %arg1: i32) -> (i32, i32, i32) {
    %c0_i32 = arith.constant 0 : i32
    %c0_i32_0 = arith.constant 0 : i32
    %c0_i32_1 = arith.constant 0 : i32
    return %arg0, %c0_i32, %c0_i32_0 : i32, i32, i32
  }
}

</mosaic_0001>

<bundles_post_ra>
// kernel: tpu_custom_call.1
= control target key start
LH: loop header
LB: loop body
LE: loop exit
PB: predicated region body
PF: predicated region fallthrough
CT: control target
= control target key end

     0   :  { %10 = vsyncpa [#allocation3], 0  ;;  %s4019_s0 = inlined_call_operand.hbm [shape: f32[8,128], index: 0, kind: input, shape index: {}]   ;;  %s4020_s1 = inlined_call_operand.hbm [shape: f32[8,128], index: 1, kind: input, shape index: {}]   ;;  %s4021_s2 = inlined_call_operand.hbm [shape: f32[1,1,128], index: 2, kind: output, shape index: {0}]   ;;  %s4022_s3 = inlined_call_operand.hbm [shape: f32[1,1,128], index: 3, kind: output, shape index: {1}]   ;;  %s4023_s4 = inlined_call_operand.hbm [shape: f32[1,128,128], index: 4, kind: output, shape index: {2}]  }
   0x1   :  { %11 = vsyncpa [#allocation6], 0 }
   0x2   :  { %12 = vsyncpa [#allocation4], 0 }
   0x3   :  { %13 = vsyncpa [#allocation9], 0  ;;  %s3356_s15 = smov [#allocation2]   ;;  %s3357_s17 = smov [#allocation5]  }
   0x4   :  { %s25_s16 = sshll.u32 %s3356_s15, 4  ;;  %s40_s18 = sshll.u32 %s3357_s17, 4  ;;  %s26_s16 = int_to_ptr.vmem [resolvable:$true] %s25_s16  ;;  %s41_s18 = int_to_ptr.vmem [resolvable:$true] %s40_s18 }
   0x5   :  { %s3238_s21 = scalar_lea.hbm %s4019_s0, 128 }
   0x6   :  { %p3239_p0 = scmp.ne.s32.totalorder %s4019_s0, %s3238_s21  ;;  %p3242_p1 = scmp.lt.u32.totalorder %s3238_s21, %s4019_s0 }
   0x8   :  { %p3244_p2 = pnand %p3242_p1, %p3239_p0 }
   0xa   :  { %3247 = shalt.err (!%p3244_p2)
}
   0xb   :  { %s3248_s26 = scalar_lea.vmem %s26_s16, 128  ;;  %p3253_p4 = scmp.lt.s32.totalorder %s26_s16, %s26_s16 }
   0xc   :  { %p3249_p3 = scmp.ne.s32.totalorder %s26_s16, %s3248_s26  ;;  %p3254_p5 = scmp.lt.s32.totalorder %s3248_s26, %s3248_s26 }
   0xe   :  { %p3255_p6 = por %p3254_p5, %p3253_p4 }
  0x10   :  { %p3256_p7 = pnand %p3255_p6, %p3249_p3 }
  0x12   :  { %3259 = shalt.err (!%p3256_p7)
}
  0x13   :  { %28 = dma.hbm_to_vmem [thread:$0]  %s4019_s0, 128, %s26_s16, [#allocation3]  }
  0x14   :  { %s3260_s5 = scalar_lea.hbm %s4020_s1, 128 }
  0x15   :  { %p3261_p8 = scmp.ne.s32.totalorder %s4020_s1, %s3260_s5  ;;  %p3264_p9 = scmp.lt.u32.totalorder %s3260_s5, %s4020_s1 }
  0x17   :  { %p3266_p10 = pnand %p3264_p9, %p3261_p8 }
  0x19   :  { %3269 = shalt.err (!%p3266_p10)
}
  0x1a   :  { %s3270_s10 = scalar_lea.vmem %s41_s18, 128  ;;  %p3275_p12 = scmp.lt.s32.totalorder %s41_s18, %s41_s18 }
  0x1b   :  { %p3271_p11 = scmp.ne.s32.totalorder %s41_s18, %s3270_s10  ;;  %p3276_p13 = scmp.lt.s32.totalorder %s3270_s10, %s3270_s10 }
  0x1d   :  { %p3277_p0 = por %p3276_p13, %p3275_p12 }
  0x1f   :  { %p3278_p1 = pnand %p3277_p0, %p3271_p11 }
  0x21   :  { %3281 = shalt.err (!%p3278_p1)
}
  0x22   :  { %43 = dma.hbm_to_vmem [thread:$0]  %s4020_s1, 128, %s41_s18, [#allocation6]  }
  0x23   :  { %3348 = dma.done.wait [#allocation3], 128  }
  0x24   :  { %3349 = vsyncadd [#allocation3], 4294967168 }
  0x25   :  { %3350 = dma.done.wait [#allocation6], 128  }
  0x26   :  { %3351 = vsyncadd [#allocation6], 4294967168  ;;  %v3413_v0 = vld [vmem:[#allocation2] sm:$0xff]  ;;  %v3415_v1 = vld [vmem:[#allocation5] sm:$0xff]  ;;  %vm130_vm0 = vcmask 64512   ;;  %s3359_s1 = smov [#allocation8]  }
  0x27   :  { %4082 = vst [vmem:[#allocation15_spill] sm:$0xff] %v3413_v0  ;;  %4083 = vst [vmem:[#allocation16_spill] sm:$0xff] %v3415_v1  ;;  %98 = vxpose.xlu0.b32.start.end [1/1] (short) %v3413_v0, 128  ;;  %v3419_v2 = vand.u32 4294901760, %v3413_v0  ;;  %v3422_v3 = vand.u32 4294901760, %v3415_v1  ;;  %s2521_s12 = sshll.u32 %s3359_s1, 4  ;;  %s3360_s13 = smov [#allocation7]   ;;  %s2522_s12 = int_to_ptr.vmem [resolvable:$true] %s2521_s12 }
  0x28   :  { %s2511_s14 = sshll.u32 %s3360_s13, 4  ;;  %s3282_s15 = scalar_lea.vmem %s2522_s12, 16  ;;  %s2512_s14 = int_to_ptr.vmem [resolvable:$true] %s2511_s14 }
  0x29   :  { %2758 = vmatprep.subr.mxu0 %v3419_v2  ;;  %2914 = vmatprep.subr.mxu1 %v3422_v3  ;;  %v3431_v4 = vsub.f32 %v3413_v0, %v3419_v2  ;;  %v3440_v8 = vsub.f32 %v3415_v1, %v3422_v3  ;;  %p3283_p2 = scmp.ne.s32.totalorder %s2522_s12, %s3282_s15  ;;  %s3286_s16 = scalar_lea.vmem %s2522_s12, 32 }
  0x2a   :  { %2759 = vmatpush3.msra.mxu0 %v3419_v2  ;;  %2915 = vmatpush3.msra.mxu1 %v3422_v3  ;;  %p3287_p3 = scmp.lt.s32.totalorder %s2522_s12, %s2522_s12  ;;  %p3288_p4 = scmp.lt.s32.totalorder %s3286_s16, %s3282_s15 }
  0x2b   :  { %v3434_v5 = vand.u32 4294901760, %v3431_v4  ;;  %v3443_v9 = vand.u32 4294901760, %v3440_v8 }
  0x2c   :  { %p3289_p5 = por %p3288_p4, %p3287_p3 }
  0x2d   :  { %v409_v6 = vsub.f32 %v3431_v4, %v3434_v5  ;;  %v1580_v10 = vsub.f32 %v3440_v8, %v3443_v9 }
  0x2e   :  { %p3290_p6 = pnand %p3289_p5, %p3283_p2 }
  0x2f   :  { %v410_v7 = vand.u32 4294901760, %v409_v6  ;;  %v3447_v11 = vand.u32 4294901760, %v1580_v10 }
  0x31   :  { %2784 = vmatprep.subr.mxu0 %v410_v7  ;;  %2940 = vmatprep.subr.mxu1 %v3447_v11 }
  0x64   :  { %1270 = vxpose.xlu0.b32.start.end [1/1] (short) %v3415_v1, 128 }
  0xa7   :  { %v114_v12 = vpop.trf.xlu0 }
  0xa8   :  { %v132_v13 = vsel %vm130_vm0, %v114_v12, 0 }
  0xa9   :  { %v3451_v14 = vand.u32 4294901760, %v132_v13 }
  0xab   :  { %v3454_v15 = vsub.f32 %v132_v13, %v3451_v14  ;;  %v115_v16 = vpop.trf.xlu0 }
  0xac   :  { %v135_v17 = vsel %vm130_vm0, %v115_v16, 0 }
  0xad   :  { %v3457_v18 = vand.u32 4294901760, %v135_v17  ;;  %v4045_v19 = vand.u32 4294901760, %v3454_v15 }
  0xaf   :  { %v3461_v20 = vsub.f32 %v135_v17, %v3457_v18  ;;  %v116_v21 = vpop.trf.xlu0  ;;  %v248_v22 = vsub.f32 %v3454_v15, %v4045_v19 }
  0xb0   :  { %v138_v23 = vsel %vm130_vm0, %v116_v21, 0 }
  0xb1   :  { %v4044_v24 = vand.u32 4294901760, %v3461_v20  ;;  %v3468_v25 = vand.u32 4294901760, %v138_v23  ;;  %v249_v26 = vand.u32 4294901760, %v248_v22 }
  0xb3   :  { %v3471_v27 = vsub.f32 %v138_v23, %v3468_v25  ;;  %2760 = vmatprep.mubr.f32.mxu0 %v249_v26  ;;  %v117_v28 = vpop.trf.xlu0  ;;  %v258_v29 = vsub.f32 %v3461_v20, %v4044_v24 }
  0xb4   :  { %v141_v30 = vsel %vm130_vm0, %v117_v28, 0 }
  0xb5   :  { %v4042_v31 = vand.u32 4294901760, %v3471_v27  ;;  %v3478_v32 = vand.u32 4294901760, %v141_v30  ;;  %v259_v33 = vand.u32 4294901760, %v258_v29 }
  0xb7   :  { %v3481_v34 = vsub.f32 %v141_v30, %v3478_v32  ;;  %v118_v35 = vpop.trf.xlu0  ;;  %2761 = vmatmul.mubr.f32.vlgmr.msra.gmra.mrb[0].mxu0 %v259_v33  ;;  %v268_v36 = vsub.f32 %v3471_v27, %v4042_v31 }
  0xb8   :  { %v144_v37 = vsel %vm130_vm0, %v118_v35, 0  ;;  %2785 = vmatpush3.msra.mxu0 %v410_v7 }
  0xb9   :  { %v4041_v38 = vand.u32 4294901760, %v3481_v34  ;;  %v3488_v39 = vand.u32 4294901760, %v144_v37  ;;  %v269_v40 = vand.u32 4294901760, %v268_v36  ;;  %2810 = vmatprep.subr.mxu0 %v3431_v4 }
  0xbb   :  { %v3492_v41 = vsub.f32 %v144_v37, %v3488_v39  ;;  %v119_v42 = vpop.trf.xlu0  ;;  %2763 = vmatprep.mubr.f32.mxu0 %v269_v40  ;;  %v278_v43 = vsub.f32 %v3481_v34, %v4041_v38 }
  0xbc   :  { %v147_v44 = vsel %vm130_vm0, %v119_v42, 0 }
  0xbd   :  { %v4039_v45 = vand.u32 4294901760, %v3492_v41  ;;  %v3499_v46 = vand.u32 4294901760, %v147_v44  ;;  %v279_v47 = vand.u32 4294901760, %v278_v43 }
  0xbf   :  { %v3502_v48 = vsub.f32 %v147_v44, %v3499_v46  ;;  %v120_v49 = vpop.trf.xlu0  ;;  %2764 = vmatmul.mubr.f32.gmra.mrb[2].mxu0 %v279_v47  ;;  %v288_v50 = vsub.f32 %v3492_v41, %v4039_v45 }
  0xc0   :  { %v150_v51 = vsel %vm130_vm0, %v120_v49, 0 }
  0xc1   :  { %v4038_v52 = vand.u32 4294901760, %v3502_v48  ;;  %v3509_v53 = vand.u32 4294901760, %v150_v51  ;;  %v289_v54 = vand.u32 4294901760, %v288_v50 }
  0xc3   :  { %v3512_v55 = vsub.f32 %v150_v51, %v3509_v53  ;;  %v121_v56 = vpop.trf.xlu0  ;;  %2766 = vmatprep.mubr.f32.mxu0 %v289_v54  ;;  %v298_v57 = vsub.f32 %v3502_v48, %v4038_v52 }
  0xc4   :  { %v153_v58 = vsel %vm130_vm0, %v121_v56, 0 }
  0xc5   :  { %v4036_v59 = vand.u32 4294901760, %v3512_v55  ;;  %v3519_v60 = vand.u32 4294901760, %v153_v58  ;;  %v299_v61 = vand.u32 4294901760, %v298_v57 }
  0xc7   :  { %v3522_v62 = vsub.f32 %v153_v58, %v3519_v60  ;;  %v122_v63 = vpop.trf.xlu0  ;;  %2767 = vmatmul.mubr.f32.gmra.mrb[4].mxu0 %v299_v61  ;;  %v308_v6 = vsub.f32 %v3512_v55, %v4036_v59 }
  0xc8   :  { %v156_v7 = vsel %vm130_vm0, %v122_v63, 0 }
  0xc9   :  { %v4034_v10 = vand.u32 4294901760, %v3522_v62  ;;  %v3529_v12 = vand.u32 4294901760, %v156_v7  ;;  %v309_v13 = vand.u32 4294901760, %v308_v6 }
  0xcb   :  { %v3532_v16 = vsub.f32 %v156_v7, %v3529_v12  ;;  %v123_v17 = vpop.trf.xlu0  ;;  %2769 = vmatprep.mubr.f32.mxu0 %v309_v13  ;;  %v318_v21 = vsub.f32 %v3522_v62, %v4034_v10 }
  0xcc   :  { %v159_v22 = vsel %vm130_vm0, %v123_v17, 0 }
  0xcd   :  { %v4032_v23 = vand.u32 4294901760, %v3532_v16  ;;  %v3539_v26 = vand.u32 4294901760, %v159_v22  ;;  %v319_v28 = vand.u32 4294901760, %v318_v21 }
  0xcf   :  { %4084 = vst [vmem:[#allocation17_spill] sm:$0xff] %v3539_v26  ;;  %v3542_v29 = vsub.f32 %v159_v22, %v3539_v26  ;;  %v124_v30 = vpop.trf.xlu0  ;;  %2770 = vmatmul.mubr.f32.gmra.mrb[6].mxu0 %v319_v28  ;;  %v328_v33 = vsub.f32 %v3532_v16, %v4032_v23 }
  0xd0   :  { %v162_v35 = vsel %vm130_vm0, %v124_v30, 0 }
  0xd1   :  { %v4030_v36 = vand.u32 4294901760, %v3542_v29  ;;  %v3549_v37 = vand.u32 4294901760, %v162_v35  ;;  %v329_v40 = vand.u32 4294901760, %v328_v33 }
  0xd3   :  { %4085 = vst [vmem:[#allocation18_spill] sm:$0xff] %v3549_v37  ;;  %v3552_v42 = vsub.f32 %v162_v35, %v3549_v37  ;;  %v125_v43 = vpop.trf.xlu0  ;;  %2772 = vmatprep.mubr.f32.mxu0 %v329_v40  ;;  %v338_v44 = vsub.f32 %v3542_v29, %v4030_v36 }
  0xd4   :  { %v165_v47 = vsel %vm130_vm0, %v125_v43, 0 }
  0xd5   :  { %v4028_v49 = vand.u32 4294901760, %v3552_v42  ;;  %v3559_v50 = vand.u32 4294901760, %v165_v47  ;;  %v339_v51 = vand.u32 4294901760, %v338_v44 }
  0xd7   :  { %4086 = vst [vmem:[#allocation19_spill] sm:$0xff] %v3559_v50  ;;  %v3562_v54 = vsub.f32 %v165_v47, %v3559_v50  ;;  %v126_v56 = vpop.trf.xlu0  ;;  %2773 = vmatmul.mubr.f32.gmra.mrb[8].mxu0 %v339_v51  ;;  %v348_v57 = vsub.f32 %v3552_v42, %v4028_v49 }
  0xd8   :  { %v168_v58 = vsel %vm130_vm0, %v126_v56, 0 }
  0xd9   :  { %v4026_v61 = vand.u32 4294901760, %v3562_v54  ;;  %v3569_v63 = vand.u32 4294901760, %v168_v58  ;;  %v349_v6 = vand.u32 4294901760, %v348_v57 }
  0xdb   :  { %4087 = vst [vmem:[#allocation20_spill] sm:$0xff] %v3569_v63  ;;  %v3572_v7 = vsub.f32 %v168_v58, %v3569_v63  ;;  %v127_v13 = vpop.trf.xlu0  ;;  %2775 = vmatprep.mubr.f32.mxu0 %v349_v6  ;;  %v358_v17 = vsub.f32 %v3562_v54, %v4026_v61 }
  0xdc   :  { %v171_v21 = vsel %vm130_vm0, %v127_v13, 0 }
  0xdd   :  { %v4025_v22 = vand.u32 4294901760, %v3572_v7  ;;  %v3579_v28 = vand.u32 4294901760, %v171_v21  ;;  %v359_v30 = vand.u32 4294901760, %v358_v17 }
  0xdf   :  { %4088 = vst [vmem:[#allocation21_spill] sm:$0xff] %v3579_v28  ;;  %v3582_v33 = vsub.f32 %v171_v21, %v3579_v28  ;;  %v128_v35 = vpop.trf.xlu0  ;;  %2776 = vmatmul.mubr.f32.gmra.mrb[10].mxu0 %v359_v30  ;;  %v368_v40 = vsub.f32 %v3572_v7, %v4025_v22 }
  0xe0   :  { %v174_v43 = vsel %vm130_vm0, %v128_v35, 0 }
  0xe1   :  { %v4024_v44 = vand.u32 4294901760, %v3582_v33  ;;  %v3589_v47 = vand.u32 4294901760, %v174_v43  ;;  %v369_v51 = vand.u32 4294901760, %v368_v40 }
  0xe3   :  { %4089 = vst [vmem:[#allocation22_spill] sm:$0xff] %v3589_v47  ;;  %v3592_v56 = vsub.f32 %v174_v43, %v3589_v47  ;;  %v129_v57 = vpop.trf.xlu0  ;;  %2778 = vmatprep.mubr.f32.mxu0 %v369_v51  ;;  %v378_v58 = vsub.f32 %v3582_v33, %v4024_v44 }
  0xe4   :  { %v177_v6 = vsel %vm130_vm0, %v129_v57, 0 }
  0xe5   :  { %v4027_v13 = vand.u32 4294901760, %v3592_v56  ;;  %v3599_v17 = vand.u32 4294901760, %v177_v6  ;;  %v379_v21 = vand.u32 4294901760, %v378_v58 }
  0xe7   :  { %4090 = vst [vmem:[#allocation23_spill] sm:$0xff] %v3599_v17  ;;  %v3602_v30 = vsub.f32 %v177_v6, %v3599_v17  ;;  %v1286_v35 = vpop.trf.xlu0  ;;  %2779 = vmatmul.mubr.f32.gmra.mrb[12].mxu0 %v379_v21  ;;  %v388_v40 = vsub.f32 %v3592_v56, %v4027_v13 }
  0xe8   :  { %v1303_v43 = vsel %vm130_vm0, %v1286_v35, 0 }
  0xe9   :  { %v4029_v51 = vand.u32 4294901760, %v3602_v30  ;;  %v3609_v44 = vand.u32 4294901760, %v1303_v43  ;;  %v389_v57 = vand.u32 4294901760, %v388_v40 }
  0xeb   :  { %v3612_v22 = vsub.f32 %v1303_v43, %v3609_v44  ;;  %v1287_v58 = vpop.trf.xlu0  ;;  %2781 = vmatprep.mubr.f32.mxu0 %v389_v57  ;;  %v398_v6 = vsub.f32 %v3602_v30, %v4029_v51 }
  0xec   :  { %v1306_v21 = vsel %vm130_vm0, %v1287_v58, 0 }
  0xed   :  { %v3618_v61 = vand.u32 4294901760, %v1306_v21  ;;  %v399_v13 = vand.u32 4294901760, %v398_v6  ;;  %v4031_v35 = vand.u32 4294901760, %v3612_v22 }
  0xef   :  { %v3622_v49 = vsub.f32 %v1306_v21, %v3618_v61  ;;  %v1288_v40 = vpop.trf.xlu0  ;;  %2782 = vmatmul.mubr.f32.gmra.mrb[14].mxu0 %v399_v13  ;;  %v1419_v43 = vsub.f32 %v3612_v22, %v4031_v35 }
  0xf0   :  { %v1309_v57 = vsel %vm130_vm0, %v1288_v40, 0  ;;  %2786 = vmatprep.mubr.f32.mxu0 %v3451_v14 }
  0xf1   :  { %v4033_v58 = vand.u32 4294901760, %v3622_v49  ;;  %v3630_v51 = vand.u32 4294901760, %v1309_v57  ;;  %v1420_v6 = vand.u32 4294901760, %v1419_v43 }
  0xf3   :  { %v3633_v36 = vsub.f32 %v1309_v57, %v3630_v51  ;;  %2916 = vmatprep.mubr.f32.mxu1 %v1420_v6  ;;  %v1289_v21 = vpop.trf.xlu0  ;;  %2787 = vmatmul.mubr.f32.vlgmr.msra.gmra.mrb[0].mxu0 %v3457_v18  ;;  %v1429_v13 = vsub.f32 %v3622_v49, %v4033_v58 }
  0xf4   :  { %v1312_v40 = vsel %vm130_vm0, %v1289_v21, 0  ;;  %2789 = vmatprep.mubr.f32.mxu0 %v3468_v25  ;;  %2811 = vmatpush3.msra.mxu0 %v3431_v4 }
  0xf5   :  { %v4035_v35 = vand.u32 4294901760, %v3633_v36  ;;  %v3643_v43 = vand.u32 4294901760, %v1312_v40  ;;  %v1430_v57 = vand.u32 4294901760, %v1429_v13  ;;  %2836 = vmatprep.subr.mxu0 %v3419_v2 }
  0xf7   :  { %v3647_v6 = vsub.f32 %v1312_v40, %v3643_v43  ;;  %2917 = vmatmul.mubr.f32.vlgmr.msra.gmra.mrb[0].mxu1 %v1430_v57  ;;  %v1290_v23 = vpop.trf.xlu0  ;;  %2790 = vmatmul.mubr.f32.gmra.mrb[2].mxu0 %v3478_v32  ;;  %v1439_v21 = vsub.f32 %v3633_v36, %v4035_v35 }
  0xf8   :  { %v1315_v4 = vsel %vm130_vm0, %v1290_v23, 0  ;;  %2792 = vmatprep.mubr.f32.mxu0 %v3488_v39  ;;  %2941 = vmatpush3.msra.mxu1 %v3447_v11 }
  0xf9   :  { %v4037_v13 = vand.u32 4294901760, %v3647_v6  ;;  %v3657_v58 = vand.u32 4294901760, %v1315_v4  ;;  %v1440_v40 = vand.u32 4294901760, %v1439_v21  ;;  %2966 = vmatprep.subr.mxu1 %v3440_v8 }
  0xfb   :  { %v3661_v57 = vsub.f32 %v1315_v4, %v3657_v58  ;;  %2919 = vmatprep.mubr.f32.mxu1 %v1440_v40  ;;  %v1291_v10 = vpop.trf.xlu0  ;;  %2793 = vmatmul.mubr.f32.gmra.mrb[4].mxu0 %v3499_v46  ;;  %v1449_v23 = vsub.f32 %v3647_v6, %v4037_v13 }
  0xfc   :  { %v1318_v11 = vsel %vm130_vm0, %v1291_v10, 0  ;;  %2795 = vmatprep.mubr.f32.mxu0 %v3509_v53 }
  0xfd   :  { %v4040_v35 = vand.u32 4294901760, %v3661_v57  ;;  %v3670_v21 = vand.u32 4294901760, %v1318_v11  ;;  %v1450_v59 = vand.u32 4294901760, %v1449_v23 }
  0xff   :  { %v3673_v4 = vsub.f32 %v1318_v11, %v3670_v21  ;;  %2920 = vmatmul.mubr.f32.gmra.mrb[2].mxu1 %v1450_v59  ;;  %v1292_v40 = vpop.trf.xlu0  ;;  %2796 = vmatmul.mubr.f32.gmra.mrb[6].mxu0 %v3519_v60  ;;  %v1459_v13 = vsub.f32 %v3661_v57, %v4040_v35 }
 0x100   :  { %v1321_v10 = vsel %vm130_vm0, %v1292_v40, 0  ;;  %2798 = vmatprep.mubr.f32.mxu0 %v3529_v12 }
 0x101   :  { %v4043_v52 = vand.u32 4294901760, %v3673_v4  ;;  %v3682_v45 = vand.u32 4294901760, %v1321_v10  ;;  %v1460_v23 = vand.u32 4294901760, %v1459_v13 }
 0x103   :  { %v3685_v11 = vsub.f32 %v1321_v10, %v3682_v45  ;;  %2922 = vmatprep.mubr.f32.mxu1 %v1460_v23  ;;  %v1293_v59 = vpop.trf.xlu0  ;;  %2799 = vmatmul.mubr.f32.gmra.mrb[8].mxu0 %v3539_v26  ;;  %v1469_v35 = vsub.f32 %v3673_v4, %v4043_v52 }
 0x104   :  { %v1324_v40 = vsel %vm130_vm0, %v1293_v59, 0  ;;  %2801 = vmatprep.mubr.f32.mxu0 %v3549_v37 }
 0x105   :  { %v4046_v38 = vand.u32 4294901760, %v3685_v11  ;;  %v3694_v31 = vand.u32 4294901760, %v1324_v40  ;;  %v1470_v13 = vand.u32 4294901760, %v1469_v35 }
 0x107   :  { %v3697_v10 = vsub.f32 %v1324_v40, %v3694_v31  ;;  %2923 = vmatmul.mubr.f32.gmra.mrb[4].mxu1 %v1470_v13  ;;  %v1294_v23 = vpop.trf.xlu0  ;;  %2802 = vmatmul.mubr.f32.gmra.mrb[10].mxu0 %v3559_v50  ;;  %v1479_v52 = vsub.f32 %v3685_v11, %v4046_v38 }
 0x108   :  { %v1327_v59 = vsel %vm130_vm0, %v1294_v23, 0  ;;  %2804 = vmatprep.mubr.f32.mxu0 %v3569_v63 }
 0x109   :  { %v4051_v24 = vand.u32 4294901760, %v3697_v10  ;;  %v3706_v19 = vand.u32 4294901760, %v1327_v59  ;;  %v1480_v35 = vand.u32 4294901760, %v1479_v52 }
 0x10b   :  { %v3709_v40 = vsub.f32 %v1327_v59, %v3706_v19  ;;  %2925 = vmatprep.mubr.f32.mxu1 %v1480_v35  ;;  %v1295_v13 = vpop.trf.xlu0  ;;  %2805 = vmatmul.mubr.f32.gmra.mrb[12].mxu0 %v3579_v28  ;;  %v1489_v38 = vsub.f32 %v3697_v10, %v4051_v24 }
 0x10c   :  { %v1330_v23 = vsel %vm130_vm0, %v1295_v13, 0  ;;  %2807 = vmatprep.mubr.f32.mxu0 %v3589_v47 }
 0x10d   :  { %4091 = vst [vmem:[#allocation24_spill] sm:$0xff] %v3709_v40  ;;  %v4056_v0 = vand.u32 4294901760, %v3709_v40  ;;  %v3718_v1 = vand.u32 4294901760, %v1330_v23  ;;  %v1490_v52 = vand.u32 4294901760, %v1489_v38 }
 0x10f   :  { %v3721_v59 = vsub.f32 %v1330_v23, %v3718_v1  ;;  %2926 = vmatmul.mubr.f32.gmra.mrb[6].mxu1 %v1490_v52  ;;  %v1296_v35 = vpop.trf.xlu0  ;;  %2808 = vmatmul.mubr.f32.gmra.mrb[14].mxu0 %v3599_v17  ;;  %v1499_v24 = vsub.f32 %v3709_v40, %v4056_v0 }
 0x110   :  { %v1333_v13 = vsel %vm130_vm0, %v1296_v35, 0  ;;  %2812 = vmatprep.mubr.f32.mxu0 %v3454_v15 }
 0x111   :  { %4092 = vst [vmem:[#allocation25_spill] sm:$0xff] %v3721_v59  ;;  %v4061_v47 = vand.u32 4294901760, %v3721_v59  ;;  %v3730_v28 = vand.u32 4294901760, %v1333_v13  ;;  %v1500_v38 = vand.u32 4294901760, %v1499_v24 }
 0x113   :  { %v3733_v23 = vsub.f32 %v1333_v13, %v3730_v28  ;;  %2928 = vmatprep.mubr.f32.mxu1 %v1500_v38  ;;  %v1297_v52 = vpop.trf.xlu0  ;;  %2813 = vmatmul.mubr.f32.vlgmr.msra.gmra.mrb[0].mxu0 %v3461_v20  ;;  %v1509_v0 = vsub.f32 %v3721_v59, %v4061_v47 }
 0x114   :  { %v1336_v35 = vsel %vm130_vm0, %v1297_v52, 0  ;;  %2815 = vmatprep.mubr.f32.mxu0 %v3471_v27  ;;  %2837 = vmatpush3.msra.mxu0 %v3419_v2 }
 0x115   :  { %4093 = vst [vmem:[#allocation26_spill] sm:$0xff] %v3733_v23  ;;  %v4066_v17 = vand.u32 4294901760, %v3733_v23  ;;  %v3743_v24 = vand.u32 4294901760, %v1336_v35  ;;  %v1510_v13 = vand.u32 4294901760, %v1509_v0  ;;  %2862 = vmatprep.subr.mxu0 %v3434_v5 }
 0x117   :  { %v3747_v38 = vsub.f32 %v1336_v35, %v3743_v24  ;;  %2929 = vmatmul.mubr.f32.gmra.mrb[8].mxu1 %v1510_v13  ;;  %v1298_v63 = vpop.trf.xlu0  ;;  %2816 = vmatmul.mubr.f32.gmra.mrb[2].mxu0 %v3481_v34  ;;  %v1519_v52 = vsub.f32 %v3733_v23, %v4066_v17 }
 0x118   :  { %v1339_v47 = vsel %vm130_vm0, %v1298_v63, 0  ;;  %2818 = vmatprep.mubr.f32.mxu0 %v3492_v41 }
 0x119   :  { %4094 = vst [vmem:[#allocation27_spill] sm:$0xff] %v3747_v38  ;;  %v4071_v50 = vand.u32 4294901760, %v3747_v38  ;;  %v3756_v0 = vand.u32 4294901760, %v1339_v47  ;;  %v1520_v37 = vand.u32 4294901760, %v1519_v52 }
 0x11b   :  { %v3759_v35 = vsub.f32 %v1339_v47, %v3756_v0  ;;  %2931 = vmatprep.mubr.f32.mxu1 %v1520_v37  ;;  %v1299_v13 = vpop.trf.xlu0  ;;  %2819 = vmatmul.mubr.f32.gmra.mrb[4].mxu0 %v3502_v48  ;;  %v1529_v17 = vsub.f32 %v3747_v38, %v4071_v50 }
 0x11c   :  { %v1342_v63 = vsel %vm130_vm0, %v1299_v13, 0  ;;  %2821 = vmatprep.mubr.f32.mxu0 %v3512_v55 }
 0x11d   :  { %4095 = vst [vmem:[#allocation28_spill] sm:$0xff] %v3759_v35  ;;  %v4076_v23 = vand.u32 4294901760, %v3759_v35  ;;  %v3768_v59 = vand.u32 4294901760, %v1342_v63  ;;  %v1530_v52 = vand.u32 4294901760, %v1529_v17 }
 0x11f   :  { %v3771_v47 = vsub.f32 %v1342_v63, %v3768_v59  ;;  %2932 = vmatmul.mubr.f32.gmra.mrb[10].mxu1 %v1530_v52  ;;  %v1300_v37 = vpop.trf.xlu0  ;;  %2822 = vmatmul.mubr.f32.gmra.mrb[6].mxu0 %v3522_v62  ;;  %v1539_v50 = vsub.f32 %v3759_v35, %v4076_v23 }
 0x120   :  { %v1345_v13 = vsel %vm130_vm0, %v1300_v37, 0  ;;  %2824 = vmatprep.mubr.f32.mxu0 %v3532_v16 }
 0x121   :  { %v4081_v38 = vand.u32 4294901760, %v3771_v47  ;;  %v3780_v26 = vand.u32 4294901760, %v1345_v13  ;;  %v1540_v17 = vand.u32 4294901760, %v1539_v50 }
 0x123   :  { %v3783_v63 = vsub.f32 %v1345_v13, %v3780_v26  ;;  %2934 = vmatprep.mubr.f32.mxu1 %v1540_v17  ;;  %v1301_v52 = vpop.trf.xlu0  ;;  %2825 = vmatmul.mubr.f32.gmra.mrb[8].mxu0 %v3542_v29  ;;  %v1549_v23 = vsub.f32 %v3771_v47, %v4081_v38 }
 0x124   :  { %v1348_v37 = vsel %vm130_vm0, %v1301_v52, 0  ;;  %2827 = vmatprep.mubr.f32.mxu0 %v3552_v42 }
 0x125   :  { %v1558_v35 = vand.u32 4294901760, %v3783_v63  ;;  %v3792_v40 = vand.u32 4294901760, %v1348_v37  ;;  %v1550_v50 = vand.u32 4294901760, %v1549_v23 }
 0x127   :  { %v3795_v13 = vsub.f32 %v1348_v37, %v3792_v40  ;;  %2828 = vmatmul.mubr.f32.gmra.mrb[10].mxu0 %v3562_v54  ;;  %2935 = vmatmul.mubr.f32.gmra.mrb[12].mxu1 %v1550_v50  ;;  %v1559_v17 = vsub.f32 %v3783_v63, %v1558_v35  ;;  %v4096_v50 = vand.u32 4294901760, %v3454_v15  ;;  %v4099_v15 = vand.u32 4294901760, %v3481_v34 }
 0x128   :  { %2830 = vmatprep.mubr.f32.mxu0 %v3572_v7  ;;  %v4104_v34 = vand.u32 4294901760, %v3532_v16  ;;  %v4109_v16 = vand.u32 4294901760, %v3582_v33 }
 0x129   :  { %v1568_v52 = vand.u32 4294901760, %v3795_v13  ;;  %v1560_v38 = vand.u32 4294901760, %v1559_v17  ;;  %v4097_v17 = vand.u32 4294901760, %v3461_v20  ;;  %v4100_v20 = vand.u32 4294901760, %v3492_v41 }
 0x12a   :  { %v4105_v41 = vand.u32 4294901760, %v3542_v29  ;;  %v4110_v29 = vand.u32 4294901760, %v3592_v56 }
 0x12b   :  { %2831 = vmatmul.mubr.f32.gmra.mrb[12].mxu0 %v3582_v33  ;;  %2937 = vmatprep.mubr.f32.mxu1 %v1560_v38  ;;  %v1569_v23 = vsub.f32 %v3795_v13, %v1568_v52  ;;  %v4098_v38 = vand.u32 4294901760, %v3471_v27  ;;  %v4103_v27 = vand.u32 4294901760, %v3522_v62  ;;  %v4108_v62 = vand.u32 4294901760, %v3572_v7  ;;  %v4114_v7 = vld [vmem:[#allocation25_spill] sm:$0xff]  ;;  %v4115_v33 = vld [vmem:[#allocation18_spill] sm:$0xff] }
 0x12c   :  { %2833 = vmatprep.mubr.f32.mxu0 %v3592_v56  ;;  %v4116_v56 = vld [vmem:[#allocation26_spill] sm:$0xff] }
 0x12d   :  { %v1570_v37 = vand.u32 4294901760, %v1569_v23  ;;  %v4118_v23 = vld [vmem:[#allocation27_spill] sm:$0xff] }
 0x12f   :  { %2834 = vmatmul.mubr.f32.gmra.mrb[14].mxu0 %v3602_v30  ;;  %2938 = vmatmul.mubr.f32.gmra.mrb[14].mxu1 %v1570_v37  ;;  %v4119_v37 = vld [vmem:[#allocation20_spill] sm:$0xff] }
 0x130   :  { %2838 = vmatprep.mubr.f32.mxu0 %v4096_v50  ;;  %2942 = vmatprep.mubr.f32.mxu1 %v3609_v44  ;;  %v4120_v50 = vld [vmem:[#allocation28_spill] sm:$0xff] }
 0x133   :  { %2839 = vmatmul.mubr.f32.vlgmr.msra.gmra.mrb[0].mxu0 %v4097_v17  ;;  %2943 = vmatmul.mubr.f32.vlgmr.msra.gmra.mrb[0].mxu1 %v3618_v61  ;;  %v4121_v17 = vld [vmem:[#allocation21_spill] sm:$0xff] }
 0x134   :  { %2967 = vmatpush3.msra.mxu1 %v3440_v8  ;;  %2841 = vmatprep.mubr.f32.mxu0 %v4098_v38  ;;  %v4101_v8 = vand.u32 4294901760, %v3502_v48  ;;  %v4106_v48 = vand.u32 4294901760, %v3552_v42  ;;  %v4111_v42 = vand.u32 4294901760, %v3602_v30  ;;  %v4117_v30 = vld [vmem:[#allocation19_spill] sm:$0xff]  ;;  %v4122_v38 = vld [vmem:[#allocation22_spill] sm:$0xff] }
 0x135   :  { %2945 = vmatprep.mubr.f32.mxu1 %v3630_v51  ;;  %2863 = vmatpush3.msra.mxu0 %v3434_v5  ;;  %v4102_v5 = vand.u32 4294901760, %v3512_v55  ;;  %v4107_v55 = vand.u32 4294901760, %v3562_v54  ;;  %v4113_v54 = vld [vmem:[#allocation17_spill] sm:$0xff] }
 0x136   :  { %2992 = vmatprep.subr.mxu1 %v3422_v3  ;;  %2888 = vmatprep.subr.mxu0 %v3419_v2 }
 0x137   :  { %2842 = vmatmul.mubr.f32.gmra.mrb[2].mxu0 %v4099_v15  ;;  %2946 = vmatmul.mubr.f32.gmra.mrb[2].mxu1 %v3643_v43  ;;  %v4123_v15 = vld [vmem:[#allocation23_spill] sm:$0xff] }
 0x138   :  { %2844 = vmatprep.mubr.f32.mxu0 %v4100_v20  ;;  %2948 = vmatprep.mubr.f32.mxu1 %v3657_v58  ;;  %v4124_v20 = vand.u32 4294901760, %v3612_v22 }
 0x13b   :  { %2845 = vmatmul.mubr.f32.gmra.mrb[4].mxu0 %v4101_v8  ;;  %2949 = vmatmul.mubr.f32.gmra.mrb[4].mxu1 %v3670_v21  ;;  %v4125_v8 = vand.u32 4294901760, %v3622_v49 }
 0x13c   :  { %2847 = vmatprep.mubr.f32.mxu0 %v4102_v5  ;;  %2951 = vmatprep.mubr.f32.mxu1 %v3682_v45  ;;  %v4126_v5 = vand.u32 4294901760, %v3633_v36 }
 0x13f   :  { %2848 = vmatmul.mubr.f32.gmra.mrb[6].mxu0 %v4103_v27  ;;  %2952 = vmatmul.mubr.f32.gmra.mrb[6].mxu1 %v3694_v31 }
 0x140   :  { %2850 = vmatprep.mubr.f32.mxu0 %v4104_v34  ;;  %2954 = vmatprep.mubr.f32.mxu1 %v3706_v19 }
 0x143   :  { %2851 = vmatmul.mubr.f32.gmra.mrb[8].mxu0 %v4105_v41  ;;  %2955 = vmatmul.mubr.f32.gmra.mrb[8].mxu1 %v3718_v1 }
 0x144   :  { %2853 = vmatprep.mubr.f32.mxu0 %v4106_v48  ;;  %2957 = vmatprep.mubr.f32.mxu1 %v3730_v28 }
 0x147   :  { %2854 = vmatmul.mubr.f32.gmra.mrb[10].mxu0 %v4107_v55  ;;  %2958 = vmatmul.mubr.f32.gmra.mrb[10].mxu1 %v3743_v24 }
 0x148   :  { %2856 = vmatprep.mubr.f32.mxu0 %v4108_v62  ;;  %2960 = vmatprep.mubr.f32.mxu1 %v3756_v0 }
 0x14b   :  { %2857 = vmatmul.mubr.f32.gmra.mrb[12].mxu0 %v4109_v16  ;;  %2961 = vmatmul.mubr.f32.gmra.mrb[12].mxu1 %v3768_v59 }
 0x14c   :  { %2859 = vmatprep.mubr.f32.mxu0 %v4110_v29  ;;  %2963 = vmatprep.mubr.f32.mxu1 %v3780_v26 }
 0x14f   :  { %2860 = vmatmul.mubr.f32.gmra.mrb[14].mxu0 %v4111_v42  ;;  %2964 = vmatmul.mubr.f32.gmra.mrb[14].mxu1 %v3792_v40 }
 0x150   :  { %2864 = vmatprep.mubr.f32.mxu0 %v3451_v14  ;;  %2968 = vmatprep.mubr.f32.mxu1 %v3612_v22 }
 0x153   :  { %2865 = vmatmul.mubr.f32.vlgmr.msra.gmra.mrb[0].mxu0 %v3457_v18  ;;  %2969 = vmatmul.mubr.f32.vlgmr.msra.gmra.mrb[0].mxu1 %v3622_v49 }
 0x154   :  { %2993 = vmatpush3.msra.mxu1 %v3422_v3  ;;  %2867 = vmatprep.mubr.f32.mxu0 %v3468_v25 }
 0x155   :  { %2971 = vmatprep.mubr.f32.mxu1 %v3633_v36  ;;  %2889 = vmatpush3.msra.mxu0 %v3419_v2  ;;  %v4112_v2 = vld [vmem:[#allocation24_spill] sm:$0xff]  ;;  %v4137_v36 = vand.u32 4294901760, %v3771_v47 }
 0x156   :  { %3018 = vmatprep.subr.mxu1 %v3443_v9 }
 0x157   :  { %2868 = vmatmul.mubr.f32.gmra.mrb[2].mxu0 %v3478_v32  ;;  %2972 = vmatmul.mubr.f32.gmra.mrb[2].mxu1 %v3647_v6 }
 0x158   :  { %2870 = vmatprep.mubr.f32.mxu0 %v3488_v39  ;;  %2974 = vmatprep.mubr.f32.mxu1 %v3661_v57 }
 0x15b   :  { %2871 = vmatmul.mubr.f32.gmra.mrb[4].mxu0 %v3499_v46  ;;  %2975 = vmatmul.mubr.f32.gmra.mrb[4].mxu1 %v3673_v4 }
 0x15c   :  { %2873 = vmatprep.mubr.f32.mxu0 %v3509_v53  ;;  %2977 = vmatprep.mubr.f32.mxu1 %v3685_v11 }
 0x15f   :  { %2874 = vmatmul.mubr.f32.gmra.mrb[6].mxu0 %v3519_v60  ;;  %2978 = vmatmul.mubr.f32.gmra.mrb[6].mxu1 %v3697_v10 }
 0x160   :  { %2876 = vmatprep.mubr.f32.mxu0 %v3529_v12  ;;  %2980 = vmatprep.mubr.f32.mxu1 %v4112_v2 }
 0x163   :  { %2877 = vmatmul.mubr.f32.gmra.mrb[8].mxu0 %v4113_v54  ;;  %2981 = vmatmul.mubr.f32.gmra.mrb[8].mxu1 %v4114_v7 }
 0x164   :  { %2879 = vmatprep.mubr.f32.mxu0 %v4115_v33  ;;  %2983 = vmatprep.mubr.f32.mxu1 %v4116_v56 }
 0x167   :  { %2880 = vmatmul.mubr.f32.gmra.mrb[10].mxu0 %v4117_v30  ;;  %2984 = vmatmul.mubr.f32.gmra.mrb[10].mxu1 %v4118_v23 }
 0x168   :  { %2882 = vmatprep.mubr.f32.mxu0 %v4119_v37  ;;  %2986 = vmatprep.mubr.f32.mxu1 %v4120_v50 }
 0x16b   :  { %2883 = vmatmul.mubr.f32.gmra.mrb[12].mxu0 %v4121_v17  ;;  %2987 = vmatmul.mubr.f32.gmra.mrb[12].mxu1 %v3771_v47 }
 0x16c   :  { %2885 = vmatprep.mubr.f32.mxu0 %v4122_v38  ;;  %2989 = vmatprep.mubr.f32.mxu1 %v3783_v63 }
 0x16f   :  { %2886 = vmatmul.mubr.f32.gmra.mrb[14].mxu0 %v4123_v15  ;;  %2990 = vmatmul.mubr.f32.gmra.mrb[14].mxu1 %v3795_v13 }
 0x170   :  { %2890 = vmatprep.mubr.f32.mxu0 %v3451_v14  ;;  %2994 = vmatprep.mubr.f32.mxu1 %v4124_v20  ;;  %v4127_v14 = vand.u32 4294901760, %v3647_v6 }
 0x173   :  { %2891 = vmatmul.mubr.f32.vlgmr.msra.gmra.mrb[0].mxu0 %v3457_v18  ;;  %2995 = vmatmul.mubr.f32.vlgmr.msra.gmra.mrb[0].mxu1 %v4125_v8  ;;  %v4128_v18 = vand.u32 4294901760, %v3661_v57 }
 0x174   :  { %3019 = vmatpush3.msra.mxu1 %v3443_v9  ;;  %2893 = vmatprep.mubr.f32.mxu0 %v3468_v25  ;;  %v4129_v9 = vand.u32 4294901760, %v3673_v4  ;;  %v4130_v25 = vand.u32 4294901760, %v3685_v11 }
 0x175   :  { %2997 = vmatprep.mubr.f32.mxu1 %v4126_v5  ;;  %3044 = vmatprep.subr.mxu1 %v3422_v3 }
 0x177   :  { %2894 = vmatmul.mubr.f32.gmra.mrb[2].mxu0 %v3478_v32  ;;  %2998 = vmatmul.mubr.f32.gmra.mrb[2].mxu1 %v4127_v14  ;;  %v4131_v32 = vand.u32 4294901760, %v3697_v10 }
 0x178   :  { %2896 = vmatprep.mubr.f32.mxu0 %v3488_v39  ;;  %3000 = vmatprep.mubr.f32.mxu1 %v4128_v18  ;;  %v4132_v39 = vand.u32 4294901760, %v4112_v2 }
 0x17b   :  { %2897 = vmatmul.mubr.f32.gmra.mrb[4].mxu0 %v3499_v46  ;;  %3001 = vmatmul.mubr.f32.gmra.mrb[4].mxu1 %v4129_v9  ;;  %v4133_v46 = vand.u32 4294901760, %v4114_v7 }
 0x17c   :  { %2899 = vmatprep.mubr.f32.mxu0 %v3509_v53  ;;  %3003 = vmatprep.mubr.f32.mxu1 %v4130_v25  ;;  %v4134_v53 = vand.u32 4294901760, %v4116_v56 }
 0x17f   :  { %2900 = vmatmul.mubr.f32.gmra.mrb[6].mxu0 %v3519_v60  ;;  %3004 = vmatmul.mubr.f32.gmra.mrb[6].mxu1 %v4131_v32  ;;  %v4135_v60 = vand.u32 4294901760, %v4118_v23 }
 0x180   :  { %2902 = vmatprep.mubr.f32.mxu0 %v3529_v12  ;;  %3006 = vmatprep.mubr.f32.mxu1 %v4132_v39  ;;  %v4136_v12 = vand.u32 4294901760, %v4120_v50 }
 0x183   :  { %2903 = vmatmul.mubr.f32.gmra.mrb[8].mxu0 %v4113_v54  ;;  %3007 = vmatmul.mubr.f32.gmra.mrb[8].mxu1 %v4133_v46 }
 0x184   :  { %2905 = vmatprep.mubr.f32.mxu0 %v4115_v33  ;;  %3009 = vmatprep.mubr.f32.mxu1 %v4134_v53 }
 0x187   :  { %2906 = vmatmul.mubr.f32.gmra.mrb[10].mxu0 %v4117_v30  ;;  %3010 = vmatmul.mubr.f32.gmra.mrb[10].mxu1 %v4135_v60 }
 0x188   :  { %2908 = vmatprep.mubr.f32.mxu0 %v4119_v37  ;;  %3012 = vmatprep.mubr.f32.mxu1 %v4136_v12 }
 0x18b   :  { %2909 = vmatmul.mubr.f32.gmra.mrb[12].mxu0 %v4121_v17  ;;  %3013 = vmatmul.mubr.f32.gmra.mrb[12].mxu1 %v4137_v36 }
 0x18c   :  { %2911 = vmatprep.mubr.f32.mxu0 %v4122_v38  ;;  %3015 = vmatprep.mubr.f32.mxu1 %v1558_v35 }
 0x18f   :  { %2912 = vmatmul.mubr.f32.gmra.mrb[14].mxu0 %v4123_v15  ;;  %3016 = vmatmul.mubr.f32.gmra.mrb[14].mxu1 %v1568_v52 }
 0x190   :  { %3020 = vmatprep.mubr.f32.mxu1 %v3609_v44 }
 0x193   :  { %3021 = vmatmul.mubr.f32.vlgmr.msra.gmra.mrb[0].mxu1 %v3618_v61 }
 0x194   :  { %3045 = vmatpush3.msra.mxu1 %v3422_v3  ;;  %3023 = vmatprep.mubr.f32.mxu1 %v3630_v51  ;;  %v3358_v3 = vmov 0.0  }
 0x195   :  { %60 = vst [vmem:[#allocation7] sm:$0x1] %v3358_v3  ;;  %61 = vst [vmem:[#allocation8] sm:$0x1] %v3358_v3 }
 0x197   :  { %3024 = vmatmul.mubr.f32.gmra.mrb[2].mxu1 %v3643_v43 }
 0x198   :  { %3026 = vmatprep.mubr.f32.mxu1 %v3657_v58 }
 0x19b   :  { %3027 = vmatmul.mubr.f32.gmra.mrb[4].mxu1 %v3670_v21 }
 0x19c   :  { %3029 = vmatprep.mubr.f32.mxu1 %v3682_v45  ;;  %v89_v6 = vld [vmem:[#allocation8] sm:$0x1]  ;;  %v80_v4 = vld [vmem:[#allocation7] sm:$0x1] }
 0x19f   :  { %3030 = vmatmul.mubr.f32.gmra.mrb[6].mxu1 %v3694_v31 }
 0x1a0   :  { %3032 = vmatprep.mubr.f32.mxu1 %v3706_v19 }
 0x1a3   :  { %3033 = vmatmul.mubr.f32.gmra.mrb[8].mxu1 %v3718_v1 }
 0x1a4   :  { %3035 = vmatprep.mubr.f32.mxu1 %v3730_v28 }
 0x1a7   :  { %3036 = vmatmul.mubr.f32.gmra.mrb[10].mxu1 %v3743_v24 }
 0x1a8   :  { %3038 = vmatprep.mubr.f32.mxu1 %v3756_v0 }
 0x1ab   :  { %3039 = vmatmul.mubr.f32.gmra.mrb[12].mxu1 %v3768_v59 }
 0x1ac   :  { %3041 = vmatprep.mubr.f32.mxu1 %v3780_v26 }
 0x1af   :  { %3042 = vmatmul.mubr.f32.gmra.mrb[14].mxu1 %v3792_v40 }
 0x1b0   :  { %3046 = vmatprep.mubr.f32.mxu1 %v3609_v44 }
 0x1b3   :  { %3047 = vmatmul.mubr.f32.vlgmr.msra.gmra.mrb[0].mxu1 %v3618_v61 }
 0x1b4   :  { %3049 = vmatprep.mubr.f32.mxu1 %v3630_v51 }
 0x1b7   :  { %3050 = vmatmul.mubr.f32.gmra.mrb[2].mxu1 %v3643_v43 }
 0x1b8   :  { %3052 = vmatprep.mubr.f32.mxu1 %v3657_v58 }
 0x1bb   :  { %3053 = vmatmul.mubr.f32.gmra.mrb[4].mxu1 %v3670_v21 }
 0x1bc   :  { %3055 = vmatprep.mubr.f32.mxu1 %v3682_v45 }
 0x1bf   :  { %3056 = vmatmul.mubr.f32.gmra.mrb[6].mxu1 %v3694_v31  ;;  %v4138_v31 = vld [vmem:[#allocation16_spill] sm:$0xff] }
 0x1c0   :  { %3058 = vmatprep.mubr.f32.mxu1 %v3706_v19  ;;  %v90_v45 = vrot.slane %v4138_v31, 4  ;;  %v4139_v19 = vld [vmem:[#allocation15_spill] sm:$0xff] }
 0x1c1   :  { %v81_v49 = vrot.slane %v4139_v19, 4 }
 0x1c3   :  { %3059 = vmatmul.mubr.f32.gmra.mrb[8].mxu1 %v3718_v1  ;;  %v91_v1 = vadd.f32 %v90_v45, %v4138_v31  ;;  %v82_v61 = vadd.f32 %v81_v49, %v4139_v19 }
 0x1c4   :  { %3061 = vmatprep.mubr.f32.mxu1 %v3730_v28 }
 0x1c5   :  { %v92_v22 = vrot.slane %v91_v1, 2  ;;  %v83_v28 = vrot.slane %v82_v61, 2 }
 0x1c7   :  { %3062 = vmatmul.mubr.f32.gmra.mrb[10].mxu1 %v3743_v24  ;;  %v93_v44 = vadd.f32 %v92_v22, %v91_v1  ;;  %v84_v51 = vadd.f32 %v83_v28, %v82_v61 }
 0x1c8   :  { %3064 = vmatprep.mubr.f32.mxu1 %v3756_v0 }
 0x1c9   :  { %v94_v58 = vrot.slane %v93_v44, 1  ;;  %v85_v43 = vrot.slane %v84_v51, 1 }
 0x1cb   :  { %3065 = vmatmul.mubr.f32.gmra.mrb[12].mxu1 %v3768_v59  ;;  %v86_v57 = vadd.f32 %v85_v43, %v84_v51 }
 0x1cc   :  { %3067 = vmatprep.mubr.f32.mxu1 %v3780_v26  ;;  %v95_v26 = vadd.f32 %v94_v58, %v93_v44 }
 0x1cd   :  { %v87_v11 = vadd.f32 %v86_v57, %v80_v4 }
 0x1ce   :  { %v96_v21 = vadd.f32 %v95_v26, %v89_v6 }
 0x1cf   :  { %3068 = vmatmul.mubr.f32.gmra.mrb[14].mxu1 %v3792_v40 }
 0x1d0   :  { %97 = vst [vmem:[#allocation8] sm:$0x1] %v96_v21 }
 0x1d1   :  { %3293 = shalt.err (!%p3290_p6)
}
 0x1d2   :  { %s3294_s19 = scalar_lea.hbm %s4022_s3, 16 }
 0x1d3   :  { %p3295_p7 = scmp.ne.s32.totalorder %s4022_s3, %s3294_s19  ;;  %p3298_p8 = scmp.lt.u32.totalorder %s3294_s19, %s4022_s3 }
 0x1d5   :  { %p3300_p9 = pnand %p3298_p8, %p3295_p7 }
 0x1d7   :  { %3303 = shalt.err (!%p3300_p9)
}
 0x1d8   :  { %2524 = dma.vmem_to_hbm [thread:$0]  %s2522_s12, 16, %s4022_s3, [#allocation9]   ;;  %88 = vst [vmem:[#allocation7] sm:$0x1] %v87_v11 }
 0x1d9   :  { %s3304_s26 = scalar_lea.vmem %s2512_s14, 16  ;;  %s3308_s27 = scalar_lea.vmem %s2512_s14, 32 }
 0x1da   :  { %p3305_p10 = scmp.ne.s32.totalorder %s2512_s14, %s3304_s26  ;;  %p3309_p11 = scmp.lt.s32.totalorder %s2512_s14, %s2512_s14 }
 0x1db   :  { %p3310_p12 = scmp.lt.s32.totalorder %s3308_s27, %s3304_s26 }
 0x1dd   :  { %p3311_p13 = por %p3310_p12, %p3309_p11 }
 0x1df   :  { %p3312_p0 = pnand %p3311_p13, %p3305_p10 }
 0x1e1   :  { %3315 = shalt.err (!%p3312_p0)
}
 0x1e2   :  { %s3316_s30 = scalar_lea.hbm %s4021_s2, 16 }
 0x1e3   :  { %p3317_p1 = scmp.ne.s32.totalorder %s4021_s2, %s3316_s30  ;;  %p3320_p2 = scmp.lt.u32.totalorder %s3316_s30, %s4021_s2 }
 0x1e5   :  { %p3322_p3 = pnand %p3320_p2, %p3317_p1 }
 0x1e7   :  { %3325 = shalt.err (!%p3322_p3)
}
 0x1e8   :  { %2514 = dma.vmem_to_hbm [thread:$0]  %s2512_s14, 16, %s4021_s2, [#allocation4]  }
 0x1e9   :  { %s3361_s2 = smov [#allocation10]  }
 0x1ea   :  { %s2530_s10 = sshll.u32 %s3361_s2, 4  ;;  %s2531_s10 = int_to_ptr.vmem [resolvable:$true] %s2530_s10 }
 0x1eb   :  { %s3326_s0 = scalar_lea.vmem %s2531_s10, 2048  ;;  %p3331_p5 = scmp.lt.s32.totalorder %s2531_s10, %s2531_s10 }
 0x1ec   :  { %p3327_p4 = scmp.ne.s32.totalorder %s2531_s10, %s3326_s0  ;;  %p3332_p6 = scmp.lt.s32.totalorder %s3326_s0, %s3326_s0 }
 0x1ee   :  { %p3333_p7 = por %p3332_p6, %p3331_p5 }
 0x1f0   :  { %p3334_p8 = pnand %p3333_p7, %p3327_p4 }
 0x246   :  { %v2892_v10 = vpop.f32.mrb[0].mxu0 }
 0x247   :  { %v1176_v40 = vpop.f32.mrb[1].mxu0 }
 0x24a   :  { %v2895_v59 = vpop.f32.mrb[2].mxu0 }
 0x24b   :  { %v1188_v24 = vpop.f32.mrb[3].mxu0 }
 0x24e   :  { %v2898_v0 = vpop.f32.mrb[4].mxu0 }
 0x24f   :  { %v1200_v35 = vpop.f32.mrb[5].mxu0 }
 0x252   :  { %v2901_v47 = vpop.f32.mrb[6].mxu0 }
 0x253   :  { %v1212_v63 = vpop.f32.mrb[7].mxu0 }
 0x256   :  { %v2904_v13 = vpop.f32.mrb[8].mxu0 }
 0x257   :  { %v1224_v52 = vpop.f32.mrb[9].mxu0 }
 0x25a   :  { %v2907_v27 = vpop.f32.mrb[10].mxu0 }
 0x25b   :  { %v1236_v34 = vpop.f32.mrb[11].mxu0 }
 0x25e   :  { %v2910_v41 = vpop.f32.mrb[12].mxu0 }
 0x25f   :  { %v1248_v48 = vpop.f32.mrb[13].mxu0 }
 0x262   :  { %v2913_v55 = vpop.f32.mrb[14].mxu0 }
 0x263   :  { %v1260_v62 = vpop.f32.mrb[15].mxu0 }
 0x286   :  { %v3048_v16 = vpop.f32.mrb[0].mxu1 }
 0x287   :  { %v2458_v29 = vsub.f32 %v2892_v10, %v3048_v16  ;;  %v2347_v42 = vpop.f32.mrb[1].mxu1 }
 0x288   :  { %v2457_v2 = vsub.f32 %v1176_v40, %v2347_v42 }
 0x289   :  { %2490 = vst [vmem:[#allocation10 + $0x8] sm:$0xff] %v2458_v29 }
 0x28a   :  { %v3051_v54 = vpop.f32.mrb[2].mxu1  ;;  %2489 = vst [vmem:[#allocation10] sm:$0xff] %v2457_v2 }
 0x28b   :  { %v2460_v7 = vsub.f32 %v2895_v59, %v3051_v54  ;;  %v2359_v33 = vpop.f32.mrb[3].mxu1 }
 0x28c   :  { %v2459_v56 = vsub.f32 %v1188_v24, %v2359_v33 }
 0x28d   :  { %2492 = vst [vmem:[#allocation10 + $0x18] sm:$0xff] %v2460_v7 }
 0x28e   :  { %v3054_v30 = vpop.f32.mrb[4].mxu1  ;;  %2491 = vst [vmem:[#allocation10 + $0x10] sm:$0xff] %v2459_v56 }
 0x28f   :  { %v2462_v23 = vsub.f32 %v2898_v0, %v3054_v30  ;;  %v2371_v37 = vpop.f32.mrb[5].mxu1 }
 0x290   :  { %v2461_v50 = vsub.f32 %v1200_v35, %v2371_v37 }
 0x291   :  { %2494 = vst [vmem:[#allocation10 + $0x28] sm:$0xff] %v2462_v23 }
 0x292   :  { %v3057_v17 = vpop.f32.mrb[6].mxu1  ;;  %2493 = vst [vmem:[#allocation10 + $0x20] sm:$0xff] %v2461_v50 }
 0x293   :  { %v2464_v38 = vsub.f32 %v2901_v47, %v3057_v17  ;;  %v2383_v15 = vpop.f32.mrb[7].mxu1 }
 0x294   :  { %v2463_v20 = vsub.f32 %v1212_v63, %v2383_v15 }
 0x295   :  { %2496 = vst [vmem:[#allocation10 + $0x38] sm:$0xff] %v2464_v38 }
 0x296   :  { %v3060_v8 = vpop.f32.mrb[8].mxu1  ;;  %2495 = vst [vmem:[#allocation10 + $0x30] sm:$0xff] %v2463_v20 }
 0x297   :  { %v2466_v5 = vsub.f32 %v2904_v13, %v3060_v8  ;;  %v2395_v14 = vpop.f32.mrb[9].mxu1 }
 0x298   :  { %v2465_v18 = vsub.f32 %v1224_v52, %v2395_v14 }
 0x299   :  { %2498 = vst [vmem:[#allocation10 + $0x48] sm:$0xff] %v2466_v5 }
 0x29a   :  { %v3063_v9 = vpop.f32.mrb[10].mxu1  ;;  %2497 = vst [vmem:[#allocation10 + $0x40] sm:$0xff] %v2465_v18 }
 0x29b   :  { %v2468_v25 = vsub.f32 %v2907_v27, %v3063_v9  ;;  %v2407_v32 = vpop.f32.mrb[11].mxu1 }
 0x29c   :  { %v2467_v39 = vsub.f32 %v1236_v34, %v2407_v32 }
 0x29d   :  { %2500 = vst [vmem:[#allocation10 + $0x58] sm:$0xff] %v2468_v25 }
 0x29e   :  { %v3066_v46 = vpop.f32.mrb[12].mxu1  ;;  %2499 = vst [vmem:[#allocation10 + $0x50] sm:$0xff] %v2467_v39 }
 0x29f   :  { %v2470_v53 = vsub.f32 %v2910_v41, %v3066_v46  ;;  %v2419_v60 = vpop.f32.mrb[13].mxu1 }
 0x2a0   :  { %v2469_v12 = vsub.f32 %v1248_v48, %v2419_v60 }
 0x2a1   :  { %2502 = vst [vmem:[#allocation10 + $0x68] sm:$0xff] %v2470_v53 }
 0x2a2   :  { %v3069_v36 = vpop.f32.mrb[14].mxu1  ;;  %2501 = vst [vmem:[#allocation10 + $0x60] sm:$0xff] %v2469_v12 }
 0x2a3   :  { %v2472_v3 = vsub.f32 %v2913_v55, %v3069_v36  ;;  %v2431_v31 = vpop.f32.mrb[15].mxu1 }
 0x2a4   :  { %v2471_v45 = vsub.f32 %v1260_v62, %v2431_v31 }
 0x2a5   :  { %2504 = vst [vmem:[#allocation10 + $0x78] sm:$0xff] %v2472_v3 }
 0x2a6   :  { %2503 = vst [vmem:[#allocation10 + $0x70] sm:$0xff] %v2471_v45 }
 0x2a7   :  { %3337 = shalt.err (!%p3334_p8)
}
 0x2a8   :  { %s3338_s12 = scalar_lea.hbm %s4023_s4, 2048 }
 0x2a9   :  { %p3339_p9 = scmp.ne.s32.totalorder %s4023_s4, %s3338_s12  ;;  %p3342_p10 = scmp.lt.u32.totalorder %s3338_s12, %s4023_s4 }
 0x2ab   :  { %p3344_p11 = pnand %p3342_p10, %p3339_p9 }
 0x2ad   :  { %3347 = shalt.err (!%p3344_p11)
}
 0x2ae   :  { %s3362_s17 = smov 128   ;;  %s3363_s18 = smov 8  }
 0x2af   :  { %2536 = dma.vmem_to_hbm [thread:$0]  %s2531_s10, 2048, %s4023_s4, [#allocation9], %s3362_s17, %s3362_s17, %s3363_s18  }
 0x2b0   :  { %3352 = dma.done.wait [#allocation4], 16  }
 0x2b1   :  { %3353 = vsyncadd [#allocation4], 4294967280 }
 0x2b2   :  { %3354 = dma.done.wait [#allocation9], 2064  }
 0x2b3   :  { %3355 = vsyncadd [#allocation9], 4294965232 }
 0x2b4   :  { %2546 = vsyncpa [#allocation3], 1 }
 0x2b5   :  { %2547 = vsyncpa [#allocation6], 1 }
 0x2b6   :  { %2548 = vsyncpa [#allocation4], 1 }
 0x2b7   :  { %2549 = vsyncpa [#allocation9], 1 }

</bundles_post_ra>
